<compile_context>
chip_gen: v6e
topology: v6e:2x2x1
jax: 0.10.0
libtpu: 0.0.40
codegen_flags: <defaults>
</compile_context>

<pallas_src>
import functools

import jax
import jax.numpy as jnp
from jax.experimental import pallas as pl
from jax.experimental.pallas import tpu as pltpu


def _round_up(n, m):
    return ((n + m - 1) // m) * m


# ---------------------------------------------------------------------------
# Kernels
# ---------------------------------------------------------------------------

def _critic_kernel_fused(s_ref, a_ref,
                         w1s_ref, w1a_ref, b14_ref,
                         w2f_ref, b2f_ref,
                         wf_ref, bf_ref,
                         q_ref):
    """Twin-Q forward; layer 2 + final fused into block-diagonal matmuls.

    Intended for v6e / v7x whose MXU contraction depth is 256, so the 2H-wide
    fused dots issue as a single MXU stream per layer."""
    cdt = w1s_ref.dtype                      # compute dtype (bf16)

    s = s_ref[...].astype(cdt)
    a = a_ref[...].astype(cdt)

    # ---- Layer 1, both heads fused (no [state, action] concat) ----
    y = (jnp.dot(s, w1s_ref[...], preferred_element_type=jnp.float32)
         + jnp.dot(a, w1a_ref[...], preferred_element_type=jnp.float32)
         + b14_ref[...])
    y = jnp.maximum(y, 0.0)

    # ---- Layer 2: block-diagonal (2H, 2H), one MXU pass for both heads ----
    y = jnp.maximum(
        jnp.dot(y.astype(cdt), w2f_ref[...], preferred_element_type=jnp.float32)
        + b2f_ref[...], 0.0)

    # ---- Layer 3: block-diagonal (2H, 2), both q's in one matmul/store ----
    q = (jnp.dot(y.astype(cdt), wf_ref[...], preferred_element_type=jnp.float32)
         + bf_ref[...])
    q_ref[...] = q.astype(q_ref.dtype)


def _critic_kernel_split(s_ref, a_ref,
                         w1s_ref, w1a_ref, b14_ref,
                         w2_ref, b2_ref, w5_ref, b5_ref,
                         w3_ref, w6_ref, b36_ref,
                         q_ref):
    """Twin-Q forward with per-head (H, H) layer-2 dots (v5e: 128-wide MXU)."""
    cdt = w1s_ref.dtype
    H = w2_ref.shape[0]

    s = s_ref[...].astype(cdt)
    a = a_ref[...].astype(cdt)

    # ---- Layer 1, both heads fused (no [state, action] concat) ----
    y = (jnp.dot(s, w1s_ref[...], preferred_element_type=jnp.float32)
         + jnp.dot(a, w1a_ref[...], preferred_element_type=jnp.float32)
         + b14_ref[...])
    y = jnp.maximum(y, 0.0)
    h = y[:, :H]        # head 1 activations
    g = y[:, H:]        # head 2 activations

    # ---- Layer 2, per head (H x H fills the 128-wide MXU) ----
    h = jnp.maximum(
        jnp.dot(h.astype(cdt), w2_ref[...], preferred_element_type=jnp.float32)
        + b2_ref[...], 0.0)
    g = jnp.maximum(
        jnp.dot(g.astype(cdt), w5_ref[...], preferred_element_type=jnp.float32)
        + b5_ref[...], 0.0)

    # ---- Layer 3 (out_features = 1): VPU multiply + lane reduce, then one
    #      merged (TB, 2) store instead of two width-1 slice writes ----
    q1 = jnp.sum(h * w3_ref[...], axis=-1, keepdims=True)
    q2 = jnp.sum(g * w6_ref[...], axis=-1, keepdims=True)
    q = jnp.concatenate([q1, q2], axis=-1) + b36_ref[...]
    q_ref[...] = q.astype(q_ref.dtype)


# ---------------------------------------------------------------------------
# Wrapper
# ---------------------------------------------------------------------------

def default_fuse_layer2():
    """Fuse the two heads' layer 2 into one (2H, 2H) matmul only on chips
    whose MXU contraction depth is >= 256 (v6e / v7x); keep split H x H dots
    on v5e and older 128-wide-MXU generations."""
    try:
        kind = jax.devices()[0].device_kind.lower()
    except Exception:
        return True
    return ("v6" in kind) or ("v7" in kind) or ("7x" in kind)


def pack_critic_params(params, state_dim, *, fuse_layer2=True,
                       compute_dtype=jnp.bfloat16):
    """One-time packing of (in, out)-layout weights into the kernel layout."""
    H = params["w2"].shape[0]
    if H % 128 != 0:
        raise ValueError("hidden_size must be a multiple of 128 (lane width); "
                         f"got {H}")
    cdt = compute_dtype

    # Split layer-1 weights into state / action halves; fuse the two heads.
    w1_s, w1_a = params["w1"][:state_dim], params["w1"][state_dim:]
    w4_s, w4_a = params["w4"][:state_dim], params["w4"][state_dim:]
    packed = {
        "w1s": jnp.concatenate([w1_s, w4_s], axis=1).astype(cdt),    # (S, 2H)
        "w1a": jnp.concatenate([w1_a, w4_a], axis=1).astype(cdt),    # (A, 2H)
        "b14": jnp.concatenate([params["b1"], params["b4"]],
                               axis=1).astype(jnp.float32),          # (1, 2H)
    }
    if fuse_layer2:
        zero = jnp.zeros((H, H), params["w2"].dtype)
        w2f = jnp.block([[params["w2"], zero], [zero, params["w5"]]])  # (2H, 2H)
        wf = jnp.concatenate(
            [jnp.concatenate([params["w3"], jnp.zeros_like(params["w3"])], axis=1),
             jnp.concatenate([jnp.zeros_like(params["w6"]), params["w6"]], axis=1)],
            axis=0)                                                    # (2H, 2)
        packed.update({
            "w2f": w2f.astype(cdt),
            "b2f": jnp.concatenate([params["b2"], params["b5"]],
                                   axis=1).astype(jnp.float32),        # (1, 2H)
            "wf": wf.astype(cdt),
            "bf": jnp.concatenate([params["b3"], params["b6"]],
                                  axis=1).astype(jnp.float32),         # (1, 2)
        })
    else:
        packed.update({
            "w2": params["w2"].astype(cdt),
            "b2": params["b2"].astype(jnp.float32),
            "w5": params["w5"].astype(cdt),
            "b5": params["b5"].astype(jnp.float32),
            "w3": params["w3"].T.astype(jnp.float32),                  # (1, H)
            "w6": params["w6"].T.astype(jnp.float32),                  # (1, H)
            "b36": jnp.concatenate([params["b3"], params["b6"]],
                                   axis=1).astype(jnp.float32),        # (1, 2)
        })
    return packed


@functools.partial(jax.jit, static_argnames=("block_b", "fuse_layer2"))
def critic_forward(state, action, packed, *, block_b=2048, fuse_layer2=True):
    """Equivalent of Critic.forward(state, action) -> (q1, q2), each (B,)."""
    B, state_dim = state.shape
    action_dim = action.shape[1]
    dtype = state.dtype
    two_h = packed["b14"].shape[1]
    H = two_h // 2

    # Large batch tile to amortize per-step overhead; stays well inside the
    # v5e 16 MiB scoped-VMEM default (intermediates ~ TB x 2H f32 = ~4 MB at
    # TB=2048) and v7x's 64 MiB physical VMEM.
    TB = min(block_b, _round_up(B, 8))
    num_tiles = pl.cdiv(B, TB)        # ragged last block; no jnp.pad HBM copy

    def batch_spec(feat):
        return pl.BlockSpec((TB, feat), lambda i: (i, 0))

    def resident(arr):
        return pl.BlockSpec(arr.shape, lambda i: (0, 0))

    if fuse_layer2:
        kernel = _critic_kernel_fused
        w_names = ("w1s", "w1a", "b14", "w2f", "b2f", "wf", "bf")
    else:
        kernel = _critic_kernel_split
        w_names = ("w1s", "w1a", "b14", "w2", "b2", "w5", "b5",
                   "w3", "w6", "b36")
    weights = tuple(packed[n] for n in w_names)

    in_specs = ([batch_spec(state_dim), batch_spec(action_dim)]
                + [resident(w) for w in weights])

    flops = 2 * B * ((state_dim + action_dim) * two_h + 2 * H * H + two_h)
    bytes_accessed = int(
        state.size * jnp.dtype(state.dtype).itemsize
        + action.size * jnp.dtype(action.dtype).itemsize
        + B * 2 * jnp.dtype(dtype).itemsize
        + sum(w.size * jnp.dtype(w.dtype).itemsize for w in weights))

    q = pl.pallas_call(
        kernel,
        out_shape=jax.ShapeDtypeStruct((B, 2), dtype),
        grid=(num_tiles,),
        in_specs=in_specs,
        out_specs=pl.BlockSpec((TB, 2), lambda i: (i, 0)),
        compiler_params=pltpu.CompilerParams(
            dimension_semantics=("parallel",),
            vmem_limit_bytes=32 * 1024 * 1024),
        cost_estimate=pl.CostEstimate(
            flops=flops, transcendentals=0, bytes_accessed=bytes_accessed),
    )(state, action, *weights)

    # torch.squeeze(q, dim=-1) per head; rows beyond B never exist (out is (B, 2)).
    return q[:, 0], q[:, 1]


# ---------------------------------------------------------------------------
# Init + reference (for the self-test)
# ---------------------------------------------------------------------------

def init_critic_params(key, state_dim, action_dim, hidden_size=256,
                       dtype=jnp.float32):
    """Deterministic init matching nn.Linear's U(-1/sqrt(fan_in), 1/sqrt(fan_in))."""
    in_dim = state_dim + action_dim
    dims = [
        ("1", in_dim, hidden_size),
        ("2", hidden_size, hidden_size),
        ("3", hidden_size, 1),
        ("4", in_dim, hidden_size),
        ("5", hidden_size, hidden_size),
        ("6", hidden_size, 1),
    ]
    params = {}
    keys = jax.random.split(key, 2 * len(dims))
    for i, (name, fin, fout) in enumerate(dims):
        bound = 1.0 / float(jnp.sqrt(jnp.asarray(fin, dtype=jnp.float32)))
        params[f"w{name}"] = jax.random.uniform(
            keys[2 * i], (fin, fout), dtype=dtype, minval=-bound, maxval=bound)
        params[f"b{name}"] = jax.random.uniform(
            keys[2 * i + 1], (1, fout), dtype=dtype, minval=-bound, maxval=bound)
    return params


def critic_reference(state, action, params):
    """Pure-JAX f32 reference for correctness checking."""
    x = jnp.concatenate([state, action], axis=-1)

    def head(w_a, b_a, w_b, b_b, w_c, b_c):
        h = jnp.maximum(x @ w_a + b_a, 0.0)
        h = jnp.maximum(h @ w_b + b_b, 0.0)
        return jnp.squeeze(h @ w_c + b_c, axis=-1)

    q1 = head(params["w1"], params["b1"], params["w2"], params["b2"],
              params["w3"], params["b3"])
    q2 = head(params["w4"], params["b4"], params["w5"], params["b5"],
              params["w6"], params["b6"])
    return q1, q2


if __name__ == "__main__":
    # Small shapes consistent with the module's forward (hidden a multiple of
    # 128 so every MXU dot / store is full-lane-width).
    BATCH, STATE_DIM, ACTION_DIM, HIDDEN = 8, 16, 8, 128

    root = jax.random.PRNGKey(0)
    k_params, k_state, k_action = jax.random.split(root, 3)

    params = init_critic_params(k_params, STATE_DIM, ACTION_DIM, HIDDEN)
    state = jax.random.normal(k_state, (BATCH, STATE_DIM), dtype=jnp.float32)
    action = jax.random.normal(k_action, (BATCH, ACTION_DIM), dtype=jnp.float32)

    q1_ref, q2_ref = critic_reference(state, action, params)

    # Exercise both layer-2 variants (fused: v6e/v7x, split: v5e).  The gate
    # only affects performance; both are numerically valid on any generation.
    default_fuse = default_fuse_layer2()
    for fuse in (default_fuse, not default_fuse):
        packed = pack_critic_params(params, STATE_DIM, fuse_layer2=fuse)
        q1, q2 = critic_forward(state, action, packed, fuse_layer2=fuse)
        q1 = jax.block_until_ready(q1)
        q2 = jax.block_until_ready(q2)
        assert q1.shape == (BATCH,) and q2.shape == (BATCH,)
        # bf16 MXU operands with f32 accumulation -> loosened tolerance.
        assert jnp.allclose(q1, q1_ref, atol=3e-2, rtol=3e-2)
        assert jnp.allclose(q2, q2_ref, atol=3e-2, rtol=3e-2)

    print("KERNEL_OK")
</pallas_src>

<mosaic_0001>
module attributes {stable_mosaic.version = 11 : i64} {
  func.func @_critic_kernel_split(%arg0: i32, %arg1: memref<8x16xf32, #tpu.memory_space<vmem>>, %arg2: memref<8x8xf32, #tpu.memory_space<vmem>>, %arg3: memref<16x256xbf16, #tpu.memory_space<vmem>>, %arg4: memref<8x256xbf16, #tpu.memory_space<vmem>>, %arg5: memref<1x256xf32, #tpu.memory_space<vmem>>, %arg6: memref<128x128xbf16, #tpu.memory_space<vmem>>, %arg7: memref<1x128xf32, #tpu.memory_space<vmem>>, %arg8: memref<128x128xbf16, #tpu.memory_space<vmem>>, %arg9: memref<1x128xf32, #tpu.memory_space<vmem>>, %arg10: memref<1x128xf32, #tpu.memory_space<vmem>>, %arg11: memref<1x128xf32, #tpu.memory_space<vmem>>, %arg12: memref<1x2xf32, #tpu.memory_space<vmem>>, %arg13: memref<8x2xf32, #tpu.memory_space<vmem>>) attributes {dimension_semantics = [#tpu.dimension_semantics<parallel>], iteration_bounds = array<i64: 1>, scalar_prefetch = 0 : i64, scratch_operands = 0 : i64, tpu.core_type = #tpu.core_type<tc>, window_params = [{transform_indices = @transform_0, window_bounds = array<i64: 8, 16>}, {transform_indices = @transform_1, window_bounds = array<i64: 8, 8>}, {pipeline_mode = #tpu.pipeline_mode<synchronous>, transform_indices = @transform_2, window_bounds = array<i64: 16, 256>}, {pipeline_mode = #tpu.pipeline_mode<synchronous>, transform_indices = @transform_3, window_bounds = array<i64: 8, 256>}, {pipeline_mode = #tpu.pipeline_mode<synchronous>, transform_indices = @transform_4, window_bounds = array<i64: 1, 256>}, {pipeline_mode = #tpu.pipeline_mode<synchronous>, transform_indices = @transform_5, window_bounds = array<i64: 128, 128>}, {pipeline_mode = #tpu.pipeline_mode<synchronous>, transform_indices = @transform_6, window_bounds = array<i64: 1, 128>}, {pipeline_mode = #tpu.pipeline_mode<synchronous>, transform_indices = @transform_7, window_bounds = array<i64: 128, 128>}, {pipeline_mode = #tpu.pipeline_mode<synchronous>, transform_indices = @transform_8, window_bounds = array<i64: 1, 128>}, {pipeline_mode = #tpu.pipeline_mode<synchronous>, transform_indices = @transform_9, window_bounds = array<i64: 1, 128>}, {pipeline_mode = #tpu.pipeline_mode<synchronous>, transform_indices = @transform_10, window_bounds = array<i64: 1, 128>}, {pipeline_mode = #tpu.pipeline_mode<synchronous>, transform_indices = @transform_11, window_bounds = array<i64: 1, 2>}, {transform_indices = @transform_12, window_bounds = array<i64: 8, 2>}]} {
    %c0 = arith.constant 0 : index
    %c0_0 = arith.constant 0 : index
    %0 = vector.load %arg1[%c0, %c0_0] : memref<8x16xf32, #tpu.memory_space<vmem>>, vector<8x16xf32>
    %1 = arith.truncf %0 : vector<8x16xf32> to vector<8x16xbf16>
    %c0_1 = arith.constant 0 : index
    %c0_2 = arith.constant 0 : index
    %2 = vector.load %arg2[%c0_1, %c0_2] : memref<8x8xf32, #tpu.memory_space<vmem>>, vector<8x8xf32>
    %3 = arith.truncf %2 : vector<8x8xf32> to vector<8x8xbf16>
    %c0_3 = arith.constant 0 : index
    %c0_4 = arith.constant 0 : index
    %4 = vector.load %arg3[%c0_3, %c0_4] : memref<16x256xbf16, #tpu.memory_space<vmem>>, vector<16x256xbf16>
    %cst = arith.constant dense<0.000000e+00> : vector<8x256xf32>
    %5 = tpu.matmul %1, %4, %cst {dimension_numbers = #tpu.dot_dimension_numbers<[1], [0], [0], [1], [0, 0, 1, 1], [], []>} : vector<8x16xbf16>, vector<16x256xbf16>, vector<8x256xf32> -> vector<8x256xf32>
    %c0_5 = arith.constant 0 : index
    %c0_6 = arith.constant 0 : index
    %6 = vector.load %arg4[%c0_5, %c0_6] : memref<8x256xbf16, #tpu.memory_space<vmem>>, vector<8x256xbf16>
    %cst_7 = arith.constant dense<0.000000e+00> : vector<8x256xf32>
    %7 = tpu.matmul %3, %6, %cst_7 {dimension_numbers = #tpu.dot_dimension_numbers<[1], [0], [0], [1], [0, 0, 1, 1], [], []>} : vector<8x8xbf16>, vector<8x256xbf16>, vector<8x256xf32> -> vector<8x256xf32>
    %8 = arith.addf %5, %7 : vector<8x256xf32>
    %c0_8 = arith.constant 0 : index
    %c0_9 = arith.constant 0 : index
    %9 = vector.load %arg5[%c0_8, %c0_9] : memref<1x256xf32, #tpu.memory_space<vmem>>, vector<1x256xf32>
    %10 = vector.broadcast %9 : vector<1x256xf32> to vector<8x256xf32>
    %11 = arith.addf %8, %10 : vector<8x256xf32>
    %cst_10 = arith.constant 0.000000e+00 : f32
    %12 = vector.broadcast %cst_10 : f32 to vector<8x256xf32>
    %13 = arith.maximumf %11, %12 : vector<8x256xf32>
    %14 = vector.extract_strided_slice %13 {offsets = [0, 0], sizes = [8, 128], strides = [1, 1]} : vector<8x256xf32> to vector<8x128xf32>
    %15 = vector.extract_strided_slice %13 {offsets = [0, 128], sizes = [8, 128], strides = [1, 1]} : vector<8x256xf32> to vector<8x128xf32>
    %16 = arith.truncf %14 : vector<8x128xf32> to vector<8x128xbf16>
    %c0_11 = arith.constant 0 : index
    %c0_12 = arith.constant 0 : index
    %17 = vector.load %arg6[%c0_11, %c0_12] : memref<128x128xbf16, #tpu.memory_space<vmem>>, vector<128x128xbf16>
    %cst_13 = arith.constant dense<0.000000e+00> : vector<8x128xf32>
    %18 = tpu.matmul %16, %17, %cst_13 {dimension_numbers = #tpu.dot_dimension_numbers<[1], [0], [0], [1], [0, 0, 1, 1], [], []>} : vector<8x128xbf16>, vector<128x128xbf16>, vector<8x128xf32> -> vector<8x128xf32>
    %c0_14 = arith.constant 0 : index
    %c0_15 = arith.constant 0 : index
    %19 = vector.load %arg7[%c0_14, %c0_15] : memref<1x128xf32, #tpu.memory_space<vmem>>, vector<1x128xf32>
    %20 = vector.broadcast %19 : vector<1x128xf32> to vector<8x128xf32>
    %21 = arith.addf %18, %20 : vector<8x128xf32>
    %cst_16 = arith.constant 0.000000e+00 : f32
    %22 = vector.broadcast %cst_16 : f32 to vector<8x128xf32>
    %23 = arith.maximumf %21, %22 : vector<8x128xf32>
    %24 = arith.truncf %15 : vector<8x128xf32> to vector<8x128xbf16>
    %c0_17 = arith.constant 0 : index
    %c0_18 = arith.constant 0 : index
    %25 = vector.load %arg8[%c0_17, %c0_18] : memref<128x128xbf16, #tpu.memory_space<vmem>>, vector<128x128xbf16>
    %cst_19 = arith.constant dense<0.000000e+00> : vector<8x128xf32>
    %26 = tpu.matmul %24, %25, %cst_19 {dimension_numbers = #tpu.dot_dimension_numbers<[1], [0], [0], [1], [0, 0, 1, 1], [], []>} : vector<8x128xbf16>, vector<128x128xbf16>, vector<8x128xf32> -> vector<8x128xf32>
    %c0_20 = arith.constant 0 : index
    %c0_21 = arith.constant 0 : index
    %27 = vector.load %arg9[%c0_20, %c0_21] : memref<1x128xf32, #tpu.memory_space<vmem>>, vector<1x128xf32>
    %28 = vector.broadcast %27 : vector<1x128xf32> to vector<8x128xf32>
    %29 = arith.addf %26, %28 : vector<8x128xf32>
    %cst_22 = arith.constant 0.000000e+00 : f32
    %30 = vector.broadcast %cst_22 : f32 to vector<8x128xf32>
    %31 = arith.maximumf %29, %30 : vector<8x128xf32>
    %c0_23 = arith.constant 0 : index
    %c0_24 = arith.constant 0 : index
    %32 = vector.load %arg10[%c0_23, %c0_24] : memref<1x128xf32, #tpu.memory_space<vmem>>, vector<1x128xf32>
    %33 = vector.broadcast %32 : vector<1x128xf32> to vector<8x128xf32>
    %34 = arith.mulf %23, %33 : vector<8x128xf32>
    %cst_25 = arith.constant dense<0.000000e+00> : vector<8xf32>
    %35 = vector.multi_reduction <add>, %34, %cst_25 [1] : vector<8x128xf32> to vector<8xf32>
    %36 = vector.shape_cast %35 : vector<8xf32> to vector<8x1xf32>
    %c0_26 = arith.constant 0 : index
    %c0_27 = arith.constant 0 : index
    %37 = vector.load %arg11[%c0_26, %c0_27] : memref<1x128xf32, #tpu.memory_space<vmem>>, vector<1x128xf32>
    %38 = vector.broadcast %37 : vector<1x128xf32> to vector<8x128xf32>
    %39 = arith.mulf %31, %38 : vector<8x128xf32>
    %cst_28 = arith.constant dense<0.000000e+00> : vector<8xf32>
    %40 = vector.multi_reduction <add>, %39, %cst_28 [1] : vector<8x128xf32> to vector<8xf32>
    %41 = vector.shape_cast %40 : vector<8xf32> to vector<8x1xf32>
    %42 = tpu.concatenate %36, %41 in 1 : vector<8x1xf32>, vector<8x1xf32> -> vector<8x2xf32>
    %c0_29 = arith.constant 0 : index
    %c0_30 = arith.constant 0 : index
    %43 = vector.load %arg12[%c0_29, %c0_30] : memref<1x2xf32, #tpu.memory_space<vmem>>, vector<1x2xf32>
    %44 = vector.broadcast %43 : vector<1x2xf32> to vector<8x2xf32>
    %45 = arith.addf %42, %44 : vector<8x2xf32>
    %c0_31 = arith.constant 0 : index
    %c0_32 = arith.constant 0 : index
    %46 = vector.load %arg13[%c0_31, %c0_32] : memref<8x2xf32, #tpu.memory_space<vmem>>, vector<8x2xf32>
    tpu.vector_store %arg13[%c0_31, %c0_32], %45 {strides = array<i32>} : memref<8x2xf32, #tpu.memory_space<vmem>>, vector<8x2xf32>,
    return
  }
  func.func @transform_0(%arg0: i32) -> (i32, i32) {
    %c0_i32 = arith.constant 0 : i32
    %c0_i32_0 = arith.constant 0 : i32
    return %arg0, %c0_i32 : i32, i32
  }
  func.func @transform_1(%arg0: i32) -> (i32, i32) {
    %c0_i32 = arith.constant 0 : i32
    %c0_i32_0 = arith.constant 0 : i32
    return %arg0, %c0_i32 : i32, i32
  }
  func.func @transform_2(%arg0: i32) -> (i32, i32) {
    %c0_i32 = arith.constant 0 : i32
    %c0_i32_0 = arith.constant 0 : i32
    %c0_i32_1 = arith.constant 0 : i32
    return %c0_i32, %c0_i32_0 : i32, i32
  }
  func.func @transform_3(%arg0: i32) -> (i32, i32) {
    %c0_i32 = arith.constant 0 : i32
    %c0_i32_0 = arith.constant 0 : i32
    %c0_i32_1 = arith.constant 0 : i32
    return %c0_i32, %c0_i32_0 : i32, i32
  }
  func.func @transform_4(%arg0: i32) -> (i32, i32) {
    %c0_i32 = arith.constant 0 : i32
    %c0_i32_0 = arith.constant 0 : i32
    %c0_i32_1 = arith.constant 0 : i32
    return %c0_i32, %c0_i32_0 : i32, i32
  }
  func.func @transform_5(%arg0: i32) -> (i32, i32) {
    %c0_i32 = arith.constant 0 : i32
    %c0_i32_0 = arith.constant 0 : i32
    %c0_i32_1 = arith.constant 0 : i32
    return %c0_i32, %c0_i32_0 : i32, i32
  }
  func.func @transform_6(%arg0: i32) -> (i32, i32) {
    %c0_i32 = arith.constant 0 : i32
    %c0_i32_0 = arith.constant 0 : i32
    %c0_i32_1 = arith.constant 0 : i32
    return %c0_i32, %c0_i32_0 : i32, i32
  }
  func.func @transform_7(%arg0: i32) -> (i32, i32) {
    %c0_i32 = arith.constant 0 : i32
    %c0_i32_0 = arith.constant 0 : i32
    %c0_i32_1 = arith.constant 0 : i32
    return %c0_i32, %c0_i32_0 : i32, i32
  }
  func.func @transform_8(%arg0: i32) -> (i32, i32) {
    %c0_i32 = arith.constant 0 : i32
    %c0_i32_0 = arith.constant 0 : i32
    %c0_i32_1 = arith.constant 0 : i32
    return %c0_i32, %c0_i32_0 : i32, i32
  }
  func.func @transform_9(%arg0: i32) -> (i32, i32) {
    %c0_i32 = arith.constant 0 : i32
    %c0_i32_0 = arith.constant 0 : i32
    %c0_i32_1 = arith.constant 0 : i32
    return %c0_i32, %c0_i32_0 : i32, i32
  }
  func.func @transform_10(%arg0: i32) -> (i32, i32) {
    %c0_i32 = arith.constant 0 : i32
    %c0_i32_0 = arith.constant 0 : i32
    %c0_i32_1 = arith.constant 0 : i32
    return %c0_i32, %c0_i32_0 : i32, i32
  }
  func.func @transform_11(%arg0: i32) -> (i32, i32) {
    %c0_i32 = arith.constant 0 : i32
    %c0_i32_0 = arith.constant 0 : i32
    %c0_i32_1 = arith.constant 0 : i32
    return %c0_i32, %c0_i32_0 : i32, i32
  }
  func.func @transform_12(%arg0: i32) -> (i32, i32) {
    %c0_i32 = arith.constant 0 : i32
    %c0_i32_0 = arith.constant 0 : i32
    return %arg0, %c0_i32 : i32, i32
  }
}

</mosaic_0001>

<bundles_post_ra>
// kernel: critic_forward.1
= control target key start
LH: loop header
LB: loop body
LE: loop exit
PB: predicated region body
PF: predicated region fallthrough
CT: control target
= control target key end

     0   :  { %17 = vsyncpa [#allocation3], 0  ;;  %s954_s0 = inlined_call_operand.hbm [shape: f32[8,16], index: 0, kind: input, shape index: {}]   ;;  %s955_s1 = inlined_call_operand.hbm [shape: f32[8,8], index: 1, kind: input, shape index: {}]   ;;  %s956_s2 = inlined_call_operand.hbm [shape: bf16[16,256], index: 2, kind: input, shape index: {}]   ;;  %s957_s3 = inlined_call_operand.vmem [shape: bf16[8,256], index: 3, kind: input, shape index: {}]   ;;  %s958_s4 = inlined_call_operand.vmem [shape: f32[1,256], index: 4, kind: input, shape index: {}]   ;;  %s959_s5 = inlined_call_operand.hbm [shape: bf16[128,128], index: 5, kind: input, shape index: {}]   ;;  %s960_s6 = inlined_call_operand.hbm [shape: f32[1,128], index: 6, kind: input, shape index: {}]   ;;  %s961_s7 = inlined_call_operand.hbm [shape: bf16[128,128], index: 7, kind: input, shape index: {}]   ;;  %s962_s8 = inlined_call_operand.hbm [shape: f32[1,128], index: 8, kind: input, shape index: {}]   ;;  %s963_s9 = inlined_call_operand.vmem [shape: f32[1,128], index: 9, kind: input, shape index: {}]   ;;  %s964_s10 = inlined_call_operand.vmem [shape: f32[1,128], index: 10, kind: input, shape index: {}]   ;;  %s965_s11 = inlined_call_operand.hbm [shape: f32[1,2], index: 11, kind: input, shape index: {}]   ;;  %s966_s12 = inlined_call_operand.vmem [shape: f32[8,2], index: 12, kind: output, shape index: {}]  }
   0x1   :  { %18 = vsyncpa [#allocation5], 0 }
   0x2   :  { %19 = vsyncpa [#allocation8], 0 }
   0x3   :  { %20 = vsyncpa [#allocation11], 0 }
   0x4   :  { %21 = vsyncpa [#allocation14], 0  ;;  %s835_s21 = smov [#allocation4]   ;;  %s836_s23 = smov [#allocation7]  }
   0x5   :  { %s38_s22 = sshll.u32 %s835_s21, 4  ;;  %s63_s24 = sshll.u32 %s836_s23, 4  ;;  %s39_s22 = int_to_ptr.vmem [resolvable:$true] %s38_s22  ;;  %s64_s24 = int_to_ptr.vmem [resolvable:$true] %s63_s24 }
   0x6   :  { %s673_s25 = scalar_lea.vmem %s39_s22, 128  ;;  %p678_p1 = scmp.lt.s32.totalorder %s39_s22, %s39_s22 }
   0x7   :  { %p674_p0 = scmp.ne.s32.totalorder %s39_s22, %s673_s25  ;;  %p679_p2 = scmp.lt.s32.totalorder %s673_s25, %s673_s25 }
   0x9   :  { %p680_p3 = por %p679_p2, %p678_p1 }
   0xb   :  { %p681_p4 = pnand %p680_p3, %p674_p0 }
   0xd   :  { %684 = shalt.err (!%p681_p4)
}
   0xe   :  { %41 = dma.hbm_to_vmem [thread:$0]  %s955_s1, 128, %s39_s22, [#allocation5]  }
   0xf   :  { %s693_s28 = scalar_lea.vmem %s64_s24, 1024  ;;  %p698_p6 = scmp.lt.s32.totalorder %s64_s24, %s64_s24 }
  0x10   :  { %p694_p5 = scmp.ne.s32.totalorder %s64_s24, %s693_s28  ;;  %p699_p7 = scmp.lt.s32.totalorder %s693_s28, %s693_s28 }
  0x12   :  { %p700_p8 = por %p699_p7, %p698_p6 }
  0x14   :  { %p701_p9 = pnand %p700_p8, %p694_p5 }
  0x16   :  { %704 = shalt.err (!%p701_p9)
}
  0x17   :  { %s837_s29 = smov 64   ;;  %s838_s30 = smov 4  }
  0x18   :  { %69 = dma.hbm_to_vmem [thread:$0]  %s959_s5, 1024, %s64_s24, [#allocation8], %s837_s29, %s837_s29, %s838_s30  }
  0x19   :  { %s839_s15 = smov [#allocation10]   ;;  %s840_s17 = smov [#allocation2]  }
  0x1a   :  { %s85_s16 = sshll.u32 %s839_s15, 4  ;;  %s28_s18 = sshll.u32 %s840_s17, 4  ;;  %s86_s16 = int_to_ptr.vmem [resolvable:$true] %s85_s16  ;;  %s29_s18 = int_to_ptr.vmem [resolvable:$true] %s28_s18 }
  0x1b   :  { %s713_s1 = scalar_lea.vmem %s86_s16, 1024  ;;  %p718_p11 = scmp.lt.s32.totalorder %s86_s16, %s86_s16 }
  0x1c   :  { %p714_p10 = scmp.ne.s32.totalorder %s86_s16, %s713_s1  ;;  %p719_p12 = scmp.lt.s32.totalorder %s713_s1, %s713_s1 }
  0x1e   :  { %p720_p13 = por %p719_p12, %p718_p11 }
  0x20   :  { %p721_p0 = pnand %p720_p13, %p714_p10 }
  0x22   :  { %724 = shalt.err (!%p721_p0)
}
  0x23   :  { %91 = dma.hbm_to_vmem [thread:$0]  %s961_s7, 1024, %s86_s16, [#allocation11], %s837_s29, %s837_s29, %s838_s30  }
  0x24   :  { %s733_s21 = scalar_lea.vmem %s29_s18, 128  ;;  %p738_p2 = scmp.lt.s32.totalorder %s29_s18, %s29_s18 }
  0x25   :  { %p734_p1 = scmp.ne.s32.totalorder %s29_s18, %s733_s21  ;;  %p739_p3 = scmp.lt.s32.totalorder %s733_s21, %s733_s21 }
  0x27   :  { %p740_p4 = por %p739_p3, %p738_p2 }
  0x29   :  { %p741_p5 = pnand %p740_p4, %p734_p1 }
  0x2b   :  { %744 = shalt.err (!%p741_p5)
}
  0x2c   :  { %31 = dma.hbm_to_vmem [thread:$0]  %s954_s0, 128, %s29_s18, [#allocation3]  }
  0x2d   :  { %s841_s23 = smov [#allocation6]  }
  0x2e   :  { %s47_s24 = sshll.u32 %s841_s23, 4  ;;  %s48_s24 = int_to_ptr.vmem [resolvable:$true] %s47_s24 }
  0x2f   :  { %s753_s25 = scalar_lea.vmem %s48_s24, 256  ;;  %p758_p7 = scmp.lt.s32.totalorder %s48_s24, %s48_s24 }
  0x30   :  { %p754_p6 = scmp.ne.s32.totalorder %s48_s24, %s753_s25  ;;  %p759_p8 = scmp.lt.s32.totalorder %s753_s25, %s753_s25 }
  0x32   :  { %p760_p9 = por %p759_p8, %p758_p7 }
  0x34   :  { %p761_p10 = pnand %p760_p9, %p754_p6 }
  0x36   :  { %764 = shalt.err (!%p761_p10)
}
  0x37   :  { %s842_s7 = smov 128   ;;  %s843_s26 = smov 8  }
  0x38   :  { %53 = dma.hbm_to_vmem [thread:$0]  %s956_s2, 256, %s48_s24, [#allocation5], %s842_s7, %s842_s7, %s843_s26  }
  0x39   :  { %s844_s29 = smov [#allocation9]   ;;  %s845_s0 = smov [#allocation12]  }
  0x3a   :  { %s76_s30 = sshll.u32 %s844_s29, 4  ;;  %s98_s13 = sshll.u32 %s845_s0, 4  ;;  %s77_s30 = int_to_ptr.vmem [resolvable:$true] %s76_s30  ;;  %s99_s13 = int_to_ptr.vmem [resolvable:$true] %s98_s13 }
  0x3b   :  { %s773_s14 = scalar_lea.vmem %s77_s30, 16  ;;  %s777_s15 = scalar_lea.vmem %s77_s30, 32 }
  0x3c   :  { %p774_p11 = scmp.ne.s32.totalorder %s77_s30, %s773_s14  ;;  %p778_p12 = scmp.lt.s32.totalorder %s77_s30, %s77_s30 }
  0x3d   :  { %p779_p13 = scmp.lt.s32.totalorder %s777_s15, %s773_s14 }
  0x3f   :  { %p780_p0 = por %p779_p13, %p778_p12 }
  0x41   :  { %p781_p1 = pnand %p780_p0, %p774_p11 }
  0x43   :  { %784 = shalt.err (!%p781_p1)
}
  0x44   :  { %79 = dma.hbm_to_vmem [thread:$0]  %s960_s6, 16, %s77_s30, [#allocation8]  }
  0x45   :  { %s793_s18 = scalar_lea.vmem %s99_s13, 16  ;;  %s797_s2 = scalar_lea.vmem %s99_s13, 32 }
  0x46   :  { %p794_p2 = scmp.ne.s32.totalorder %s99_s13, %s793_s18  ;;  %p798_p3 = scmp.lt.s32.totalorder %s99_s13, %s99_s13 }
  0x47   :  { %p799_p4 = scmp.lt.s32.totalorder %s797_s2, %s793_s18 }
  0x49   :  { %p800_p5 = por %p799_p4, %p798_p3 }
  0x4b   :  { %p801_p6 = pnand %p800_p5, %p794_p2 }
  0x4d   :  { %804 = shalt.err (!%p801_p6)
}
  0x4e   :  { %101 = dma.hbm_to_vmem [thread:$0]  %s962_s8, 16, %s99_s13, [#allocation11]  }
  0x4f   :  { %s846_s20 = smov [#allocation13]  }
  0x50   :  { %s112_s21 = sshll.u32 %s846_s20, 4  ;;  %s113_s21 = int_to_ptr.vmem [resolvable:$true] %s112_s21 }
  0x51   :  { %s813_s5 = scalar_lea.vmem %s113_s21, 16  ;;  %s817_s22 = scalar_lea.vmem %s113_s21, 32 }
  0x52   :  { %p814_p7 = scmp.ne.s32.totalorder %s113_s21, %s813_s5  ;;  %p818_p8 = scmp.lt.s32.totalorder %s113_s21, %s113_s21 }
  0x53   :  { %p819_p9 = scmp.lt.s32.totalorder %s817_s22, %s813_s5 }
  0x55   :  { %p820_p10 = por %p819_p9, %p818_p8 }
  0x57   :  { %p821_p11 = pnand %p820_p10, %p814_p7 }
  0x59   :  { %824 = shalt.err (!%p821_p11)
}
  0x5a   :  { %115 = dma.hbm_to_vmem [thread:$0]  %s965_s11, 16, %s113_s21, [#allocation14]  }
  0x5b   :  { %825 = dma.done.wait [#allocation3], 128  }
  0x5c   :  { %826 = vsyncadd [#allocation3], 4294967168 }
  0x5d   :  { %827 = dma.done.wait [#allocation5], 384  }
  0x5e   :  { %828 = vsyncadd [#allocation5], 4294966912 }
  0x5f   :  { %829 = dma.done.wait [#allocation8], 1040  }
  0x60   :  { %830 = vsyncadd [#allocation8], 4294966256 }
  0x61   :  { %831 = dma.done.wait [#allocation11], 1040  }
  0x62   :  { %832 = vsyncadd [#allocation11], 4294966256 }
  0x63   :  { %833 = dma.done.wait [#allocation14], 16  }
  0x64   :  { %834 = vsyncadd [#allocation14], 4294967280  ;;  %v847_v0 = vmov 0   ;;  %v147_v1 = vld [vmem:[%s957_s3] sm:$0xff]  ;;  %vm157_vm0 = vcmask 1043456   ;;  %v143_v6 = vld [vmem:[#allocation4] sm:$0xff]  ;;  %v262_v28 = vlaneseq }
  0x65   :  { %196 = vmatprep.mubr.bf16.mxu0 %v847_v0  ;;  %251 = vmatprep.mubr.bf16.mxu1 %v847_v0  ;;  %v544_v2 = vcombine.high %v147_v1, %v147_v1  ;;  %v645_v3 = vld [vmem:[#allocation6 + $0x4] ss:$8 sps:$4 sm:$0xff]   ;;  %v543_v4 = vcombine.low %v147_v1, %v147_v1  ;;  %v648_v5 = vld [vmem:[#allocation6] ss:$8 sps:$4 sm:$0xff]   ;;  %vm153_vm1 = vcmask 64512   ;;  %v141_v7 = vld [vmem:[#allocation2] sm:$0xff]  ;;  %v144_v9 = vpack.c.bf16 %v143_v6, %v143_v6 }
  0x66   :  { %233 = vmatprep.subr.bf16.mxu1 %v645_v3  ;;  %v142_v10 = vpack.c.bf16 %v141_v7, %v141_v7  ;;  %v649_v11 = vld [vmem:[#allocation7 + $0x38] sm:$0xff]   ;;  %vm215_vm2 = vcmask 130048   ;;  %v848_v13 = vmov 0.0   ;;  %v651_v14 = vld [vmem:[#allocation7 + $0x30] sm:$0xff]   ;;  %v653_v16 = vld [vmem:[#allocation7 + $0x28] sm:$0xff]   ;;  %vm849_vm3 = vmmov 0  }
  0x67   :  { %545 = vmatprep.subr.msk.bf16.mxu0 %vm157_vm0, %v544_v2  ;;  %v159_v8 = vsel %vm157_vm0, %v543_v4, 0  ;;  %234 = vmatpush1.bf16.msra.mxu1 %v648_v5  ;;  %v650_v12 = vld [vmem:[#allocation10 + $0x38] sm:$0xff]   ;;  %v652_v15 = vld [vmem:[#allocation10 + $0x30] sm:$0xff]   ;;  %v654_v17 = vld [vmem:[#allocation10 + $0x28] sm:$0xff]   ;;  %v263_v29 = vshrl.u32 %v262_v28, 7  ;;  %vm522_vm4 = vcmask 7168  }
  0x68   :  { %179 = vmatpush1.bf16.msra.mxu0 %v159_v8  ;;  %609 = vmatprep.subr.bf16.mxu1 %v848_v13  ;;  %v655_v18 = vld [vmem:[#allocation7 + $0x20] sm:$0xff]   ;;  %v657_v20 = vld [vmem:[#allocation7 + $0x18] sm:$0xff]   ;;  %v659_v22 = vld [vmem:[#allocation7 + $0x10] sm:$0xff]   ;;  %vm532_vm5 = vcmask 15360  }
  0x69   :  { %589 = vmatprep.subr.bf16.mxu0 %v848_v13  ;;  %v656_v19 = vld [vmem:[#allocation10 + $0x20] sm:$0xff]   ;;  %v658_v21 = vld [vmem:[#allocation10 + $0x18] sm:$0xff]   ;;  %v660_v23 = vld [vmem:[#allocation10 + $0x10] sm:$0xff]   ;;  %v264_v30 = vsub.s32 0, %v263_v29  ;;  %v268_v32 = vsub.s32 1, %v263_v29 }
  0x6a   :  { %549 = vmatmul.mubr.msk.bf16.vlgmr.msra.gmra.mxu1 %vm215_vm2, %v142_v10  ;;  %v661_v24 = vld [vmem:[#allocation7 + $0x8] sm:$0xff]   ;;  %v663_v26 = vld [vmem:[#allocation7] sm:$0xff]  }
  0x6b   :  { %546 = vmatmul.mubr.msk.bf16.vlgmr.msra.gmra.mxu0 %vm153_vm1, %v144_v9  ;;  %610 = vmatpush3.bf16.msra.mxu1 %v650_v12  ;;  %v662_v25 = vld [vmem:[#allocation10 + $0x8] sm:$0xff]   ;;  %v664_v27 = vld [vmem:[#allocation10] sm:$0xff]   ;;  %v260_v31 = vld [vmem:[%s958_s4] sm:$0x3] }
  0x6c   :  { %590 = vmatpush3.bf16.msra.mxu0 %v649_v11  ;;  %611 = vmatprep.subr.bf16.mxu1 %v848_v13  ;;  %v265_v33 = vrot.slane %v260_v31, %v264_v30  ;;  %v269_v37 = vrot.slane %v260_v31, %v268_v32  ;;  %v550_v51 = vld [vmem:[#allocation9] ss:$0 sm:$0xff]  ;;  %v559_v53 = vld [vmem:[#allocation12] ss:$0 sm:$0xff]  ;;  %v570_v6 = vld [vmem:[#allocation13] ss:$0 sm:$0xff] }
  0x6d   :  { %591 = vmatprep.subr.bf16.mxu0 %v848_v13  ;;  %605 = vmatprep.mubr.msk.bf16.mxu0 %vm849_vm3, %v848_v13  ;;  %v568_v57 = vld [vmem:[%s963_s9] ss:$0 sm:$0xff] }
  0x6e   :  { %625 = vmatprep.mubr.msk.bf16.mxu1 %vm849_vm3, %v848_v13  ;;  %v569_v2 = vld [vmem:[%s964_s10] ss:$0 sm:$0xff] }
  0x6f   :  { %612 = vmatpush3.bf16.msra.mxu1 %v652_v15 }
  0x70   :  { %592 = vmatpush3.bf16.msra.mxu0 %v651_v14  ;;  %613 = vmatprep.subr.bf16.mxu1 %v848_v13 }
  0x71   :  { %593 = vmatprep.subr.bf16.mxu0 %v848_v13 }
  0x73   :  { %614 = vmatpush3.bf16.msra.mxu1 %v654_v17 }
  0x74   :  { %594 = vmatpush3.bf16.msra.mxu0 %v653_v16  ;;  %615 = vmatprep.subr.bf16.mxu1 %v848_v13 }
  0x75   :  { %595 = vmatprep.subr.bf16.mxu0 %v848_v13 }
  0x77   :  { %616 = vmatpush3.bf16.msra.mxu1 %v656_v19 }
  0x78   :  { %596 = vmatpush3.bf16.msra.mxu0 %v655_v18  ;;  %617 = vmatprep.subr.bf16.mxu1 %v848_v13 }
  0x79   :  { %597 = vmatprep.subr.bf16.mxu0 %v848_v13 }
  0x7b   :  { %618 = vmatpush3.bf16.msra.mxu1 %v658_v21 }
  0x7c   :  { %598 = vmatpush3.bf16.msra.mxu0 %v657_v20  ;;  %619 = vmatprep.subr.bf16.mxu1 %v848_v13 }
  0x7d   :  { %599 = vmatprep.subr.bf16.mxu0 %v848_v13 }
  0x7f   :  { %620 = vmatpush3.bf16.msra.mxu1 %v660_v23 }
  0x80   :  { %600 = vmatpush3.bf16.msra.mxu0 %v659_v22  ;;  %621 = vmatprep.subr.bf16.mxu1 %v848_v13 }
  0x81   :  { %601 = vmatprep.subr.bf16.mxu0 %v848_v13 }
  0x83   :  { %622 = vmatpush3.bf16.msra.mxu1 %v662_v25 }
  0x84   :  { %602 = vmatpush3.bf16.msra.mxu0 %v661_v24  ;;  %623 = vmatprep.subr.bf16.mxu1 %v848_v13 }
  0x85   :  { %603 = vmatprep.subr.bf16.mxu0 %v848_v13 }
  0x87   :  { %624 = vmatpush3.bf16.msra.mxu1 %v664_v27 }
  0x88   :  { %604 = vmatpush3.bf16.msra.mxu0 %v663_v26 }
 0x12a   :  { %v253_v35 = vpop.f32.mrf.mxu1 }
 0x12b   :  { %v198_v34 = vpop.f32.mrf.mxu0 }
 0x12c   :  { %v254_v36 = vadd.f32 %v253_v35, %v198_v34  ;;  %v255_v39 = vpop.f32.mrf.mxu1 }
 0x12d   :  { %v200_v38 = vpop.f32.mrf.mxu0 }
 0x12e   :  { %v272_v40 = vadd.f32 %v265_v33, %v254_v36  ;;  %v256_v41 = vadd.f32 %v255_v39, %v200_v38  ;;  %v257_v43 = vpop.f32.mrf.mxu1 }
 0x12f   :  { %v202_v42 = vpop.f32.mrf.mxu0 }
 0x130   :  { %v274_v44 = vmax.f32 %v272_v40, 0.0  ;;  %v273_v45 = vadd.f32 %v269_v37, %v256_v41  ;;  %v258_v47 = vpop.f32.mrf.mxu1 }
 0x131   :  { %v203_v46 = vpop.f32.mrf.mxu0 }
 0x132   :  { %v276_v48 = vpack.c.bf16 %v274_v44, %v274_v44  ;;  %v275_v49 = vmax.f32 %v273_v45, 0.0 }
 0x134   :  { %v389_v50 = vpack.c.bf16 %v275_v49, %v275_v49  ;;  %606 = vmatmul.mubr.bf16.vlgmr.msra.gmra.mxu0 %v276_v48 }
 0x136   :  { %626 = vmatmul.mubr.bf16.vlgmr.msra.gmra.mxu1 %v389_v50 }
 0x1f4   :  { %v382_v52 = vpop.f32.mrf.mxu0 }
 0x1f5   :  { %v383_v54 = vadd.f32 %v550_v51, %v382_v52 }
 0x1f6   :  { %v607_v55 = vpop.f32.mrf.mxu0  ;;  %v495_v56 = vpop.f32.mrf.mxu1 }
 0x1f7   :  { %v388_v58 = vmax.f32 %v383_v54, 0.0  ;;  %v496_v59 = vadd.f32 %v559_v53, %v495_v56 }
 0x1f8   :  { %v385_v60 = vpop.f32.mrf.mxu0  ;;  %v627_v61 = vpop.f32.mrf.mxu1 }
 0x1f9   :  { %v501_v62 = vmax.f32 %v496_v59, 0.0  ;;  %v509_v63 = vmul.f32 %v568_v57, %v388_v58 }
 0x1fa   :  { %v608_v0 = vpop.f32.mrf.mxu0  ;;  %v498_v1 = vpop.f32.mrf.mxu1 }
 0x1fb   :  { %510 = vadd.xlane.f32.xlu0 %v509_v63  ;;  %v519_v4 = vmul.f32 %v569_v2, %v501_v62 }
 0x1fc   :  { %v628_v3 = vpop.f32.mrf.mxu1 }
 0x1ff   :  { %520 = vadd.xlane.f32.xlu0 %v519_v4 }
 0x284   :  { %v511_v5 = vpop.xlane.xlu0 %510 }
 0x288   :  { %v521_v7 = vpop.xlane.xlu0 %520 }
 0x289   :  { %v523_v8 = vsel %vm522_vm4, %v511_v5, %v521_v7 }
 0x28a   :  { %v531_v9 = vadd.f32 %v570_v6, %v523_v8 }
 0x28c   :  { %533 = vst.msk [vmem:[%s966_s12] sm:$0xff] %vm532_vm5, %v531_v9 }
 0x28d   :  { %538 = vsyncpa [#allocation3], 1 }
 0x28e   :  { %539 = vsyncpa [#allocation5], 1 }
 0x28f   :  { %540 = vsyncpa [#allocation8], 1 }
 0x290   :  { %541 = vsyncpa [#allocation11], 1 }
 0x291   :  { %542 = vsyncpa [#allocation14], 1 }

</bundles_post_ra>
